<compile_context>
chip_gen: v5e
topology: v5e:2x2
jax: 0.10.0
libtpu: 0.0.40
codegen_flags: <defaults>
</compile_context>

<pallas_src>
import jax
import jax.numpy as jnp
from jax import lax
from jax.experimental import pallas as pl
from jax.experimental.pallas import tpu as pltpu


def _round_up(x, m):
    return ((x + m - 1) // m) * m


def _pad_flat(flat, multiple):
    n = flat.shape[0]
    rem = n % multiple
    if rem:
        # Pad value 1.0: with (p=1, t=1) the clamped BCE term is exactly 0.
        flat = jnp.concatenate([flat, jnp.full((multiple - rem,), 1.0, jnp.float32)])
    return flat


def _prep_mask(x):
    """Flatten; pad (only if needed) to a multiple of 128; view as (rows, 128)."""
    flat = x.reshape(-1).astype(jnp.float32)
    n = flat.shape[0]
    flat = _pad_flat(flat, 128)
    return flat.reshape(-1, 128), n


def _prep_label(x):
    """Labels are tiny: pad to a multiple of 1024 and view as (rows, 128)."""
    flat = x.reshape(-1).astype(jnp.float32)
    n = flat.shape[0]
    flat = _pad_flat(flat, 1024)
    return flat.reshape(-1, 128), n


def pixwise_bce_loss(net_mask, net_label, target_mask, target_label,
                     beta=0.5, block_rows=4096, num_parts=2):
    nm2, n_mask = _prep_mask(net_mask)
    tm2, _ = _prep_mask(target_mask)
    nl2, n_label = _prep_label(net_label)
    tl2, _ = _prep_label(target_label)

    rows_m = nm2.shape[0]
    rows_l = nl2.shape[0]

    block_rows = min(block_rows, _round_up(rows_m, 8))
    total_blocks = -(-rows_m // block_rows)
    # Never spawn more parts than real blocks (tiny inputs stay single-part).
    num_parts = max(1, min(num_parts, total_blocks))
    steps_per_part = -(-total_blocks // num_parts)
    # If (parts x steps x block_rows) coverage exactly matches rows_m, every row
    # read is real and the in-kernel mask is compiled out.
    needs_mask = (num_parts * steps_per_part * block_rows) != rows_m

    inv_n_mask = 1.0 / float(n_mask)
    inv_n_label = 1.0 / float(n_label)
    beta = float(beta)

    def mask_index_map(p, s):
        blk = p * steps_per_part + s
        # Clamp phantom blocks (beyond the last real block) onto the last real
        # block; their contribution is zeroed by the in-kernel row mask.
        return (jnp.minimum(blk, total_blocks - 1), 0)

    def label_index_map(p, s):
        return (0, 0)  # constant index -> resident, fetched once

    def kernel(nm_ref, tmk_ref, nl_ref, tl_ref, o_ref, acc_ref):
        p = pl.program_id(0)
        s = pl.program_id(1)

        @pl.when(s == 0)
        def _():
            acc_ref[...] = jnp.zeros_like(acc_ref)

        def bce_elem(pred, tgt):
            # PyTorch BCELoss clamps each log term at -100.
            logp = jnp.maximum(jnp.log(pred), -100.0)
            log1mp = jnp.maximum(jnp.log(1.0 - pred), -100.0)
            return -(tgt * logp + (1.0 - tgt) * log1mp)

        per_elem = bce_elem(nm_ref[...], tmk_ref[...])
        if needs_mask:
            blk = p * steps_per_part + s
            row_ids = lax.broadcasted_iota(jnp.int32, (block_rows, 128), 0) \
                + blk * block_rows
            per_elem = jnp.where(row_ids < rows_m, per_elem, 0.0)

        # Two-stage reduction: fold the block onto an (8,128) VPU accumulator;
        # the final cross-lane reduce happens in the JAX wrapper.
        acc_ref[...] += jnp.sum(
            per_elem.reshape(block_rows // 8, 8, 128), axis=0)

        @pl.when(s == pl.num_programs(1) - 1)
        def _():
            gate = (p == 0).astype(jnp.float32)  # binary term counted once
            label_elem = bce_elem(nl_ref[...], tl_ref[...])
            binary_acc = jnp.sum(label_elem.reshape(rows_l // 8, 8, 128), axis=0)
            out_block = acc_ref[...] * (beta * inv_n_mask) \
                + binary_acc * (gate * ((1.0 - beta) * inv_n_label))
            o_ref[...] = out_block.reshape(1, 8, 128)

    grid_spec = pltpu.PrefetchScalarGridSpec(
        num_scalar_prefetch=0,
        grid=(num_parts, steps_per_part),
        in_specs=[
            pl.BlockSpec((block_rows, 128), mask_index_map),
            pl.BlockSpec((block_rows, 128), mask_index_map),
            pl.BlockSpec((rows_l, 128), label_index_map),
            pl.BlockSpec((rows_l, 128), label_index_map),
        ],
        out_specs=pl.BlockSpec((1, 8, 128), lambda p, s: (p, 0, 0)),
        scratch_shapes=[pltpu.VMEM((8, 128), jnp.float32)],
    )

    n_elems = rows_m * 128 + rows_l * 128
    cost = pl.CostEstimate(
        flops=8 * n_elems,
        transcendentals=2 * n_elems,
        bytes_accessed=2 * 4 * n_elems + num_parts * 8 * 128 * 4,
    )

    partial = pl.pallas_call(
        kernel,
        out_shape=jax.ShapeDtypeStruct((num_parts, 8, 128), jnp.float32),
        grid_spec=grid_spec,
        compiler_params=pltpu.CompilerParams(
            dimension_semantics=("parallel", "arbitrary")),
        cost_estimate=cost,
    )(nm2, tm2, nl2, tl2)

    # Tiny epilogue: combine per-part / per-lane partial sums.
    return jnp.sum(partial)


def _reference(net_mask, net_label, target_mask, target_label, beta=0.5):
    def bce(p, t):
        logp = jnp.maximum(jnp.log(p), -100.0)
        log1mp = jnp.maximum(jnp.log(1.0 - p), -100.0)
        return jnp.mean(-(t * logp + (1.0 - t) * log1mp))

    return bce(net_mask, target_mask) * beta + bce(net_label, target_label) * (1 - beta)


if __name__ == "__main__":
    key = jax.random.PRNGKey(0)
    k1, k2, k3, k4 = jax.random.split(key, 4)

    B, C, H, W = 2, 1, 16, 16  # pixel-wise map per sample
    # Network outputs are probabilities (post-sigmoid), targets are {0,1} maps.
    net_mask = jax.nn.sigmoid(jax.random.normal(k1, (B, C, H, W), jnp.float32))
    target_mask = (jax.random.uniform(k2, (B, C, H, W)) > 0.5).astype(jnp.float32)
    net_label = jax.nn.sigmoid(jax.random.normal(k3, (B, 1), jnp.float32))
    target_label = (jax.random.uniform(k4, (B, 1)) > 0.5).astype(jnp.float32)

    loss = pixwise_bce_loss(net_mask, net_label, target_mask, target_label, beta=0.5)
    loss = jax.block_until_ready(loss)

    ref = _reference(net_mask, net_label, target_mask, target_label, beta=0.5)
    assert jnp.allclose(loss, ref, rtol=1e-5, atol=1e-5), (loss, ref)
    print("KERNEL_OK")
</pallas_src>

<mosaic_0001>
module attributes {stable_mosaic.version = 11 : i64} {
  func.func @kernel(%arg0: i32, %arg1: i32, %arg2: memref<8x128xf32, #tpu.memory_space<vmem>>, %arg3: memref<8x128xf32, #tpu.memory_space<vmem>>, %arg4: memref<8x128xf32, #tpu.memory_space<vmem>>, %arg5: memref<8x128xf32, #tpu.memory_space<vmem>>, %arg6: memref<1x8x128xf32, #tpu.memory_space<vmem>>, %arg7: memref<8x128xf32, #tpu.memory_space<vmem>>) attributes {dimension_semantics = [#tpu.dimension_semantics<parallel>, #tpu.dimension_semantics<arbitrary>], iteration_bounds = array<i64: 1, 1>, scalar_prefetch = 0 : i64, scratch_operands = 1 : i64, tpu.core_type = #tpu.core_type<tc>, window_params = [{transform_indices = @transform_0, window_bounds = array<i64: 8, 128>}, {transform_indices = @transform_1, window_bounds = array<i64: 8, 128>}, {pipeline_mode = #tpu.pipeline_mode<synchronous>, transform_indices = @transform_2, window_bounds = array<i64: 8, 128>}, {pipeline_mode = #tpu.pipeline_mode<synchronous>, transform_indices = @transform_3, window_bounds = array<i64: 8, 128>}, {transform_indices = @transform_4, window_bounds = array<i64: 1, 8, 128>}]} {
    %c0_i32 = arith.constant 0 : i32
    %0 = arith.cmpi eq, %arg1, %c0_i32 : i32
    %1 = arith.extui %0 : i1 to i32
    %c0_i32_0 = arith.constant 0 : i32
    %2 = arith.cmpi ne, %1, %c0_i32_0 : i32
    scf.if %2 {
      %cst_16 = arith.constant 0.000000e+00 : f32
      %38 = vector.broadcast %cst_16 : f32 to vector<8x128xf32>
      %c0_17 = arith.constant 0 : index
      %c0_18 = arith.constant 0 : index
      %39 = vector.load %arg7[%c0_17, %c0_18] : memref<8x128xf32, #tpu.memory_space<vmem>>, vector<8x128xf32>
      tpu.vector_store %arg7[%c0_17, %c0_18], %38 {strides = array<i32>} : memref<8x128xf32, #tpu.memory_space<vmem>>, vector<8x128xf32>,
    } else {
    }
    %c0 = arith.constant 0 : index
    %c0_1 = arith.constant 0 : index
    %3 = vector.load %arg2[%c0, %c0_1] : memref<8x128xf32, #tpu.memory_space<vmem>>, vector<8x128xf32>
    %c0_2 = arith.constant 0 : index
    %c0_3 = arith.constant 0 : index
    %4 = vector.load %arg3[%c0_2, %c0_3] : memref<8x128xf32, #tpu.memory_space<vmem>>, vector<8x128xf32>
    %5 = math.log %3 : vector<8x128xf32>
    %cst = arith.constant -1.000000e+02 : f32
    %6 = vector.broadcast %cst : f32 to vector<8x128xf32>
    %7 = arith.maximumf %5, %6 : vector<8x128xf32>
    %cst_4 = arith.constant 1.000000e+00 : f32
    %8 = vector.broadcast %cst_4 : f32 to vector<8x128xf32>
    %9 = arith.subf %8, %3 : vector<8x128xf32>
    %10 = math.log %9 : vector<8x128xf32>
    %cst_5 = arith.constant -1.000000e+02 : f32
    %11 = vector.broadcast %cst_5 : f32 to vector<8x128xf32>
    %12 = arith.maximumf %10, %11 : vector<8x128xf32>
    %13 = arith.mulf %4, %7 : vector<8x128xf32>
    %cst_6 = arith.constant 1.000000e+00 : f32
    %14 = vector.broadcast %cst_6 : f32 to vector<8x128xf32>
    %15 = arith.subf %14, %4 : vector<8x128xf32>
    %16 = arith.mulf %15, %12 : vector<8x128xf32>
    %17 = arith.addf %13, %16 : vector<8x128xf32>
    %cst_7 = arith.constant 0.000000e+00 : f32
    %18 = vector.broadcast %cst_7 : f32 to vector<8x128xf32>
    %19 = arith.subf %18, %17 : vector<8x128xf32>
    %c1_i32 = arith.constant 1 : i32
    %20 = arith.muli %arg0, %c1_i32 : i32
    %21 = arith.addi %20, %arg1 : i32
    %22 = tpu.iota {dimensions = array<i32: 0>} : vector<8x128xi32>
    %c8_i32 = arith.constant 8 : i32
    %23 = arith.muli %21, %c8_i32 : i32
    %24 = vector.broadcast %23 : i32 to vector<8x128xi32>
    %25 = arith.addi %22, %24 : vector<8x128xi32>
    %c4_i32 = arith.constant 4 : i32
    %26 = vector.broadcast %c4_i32 : i32 to vector<8x128xi32>
    %27 = arith.cmpi slt, %25, %26 : vector<8x128xi32>
    %cst_8 = arith.constant 0.000000e+00 : f32
    %28 = vector.broadcast %cst_8 : f32 to vector<8x128xf32>
    %29 = arith.select %27, %19, %28 : vector<8x128xi1>, vector<8x128xf32>
    %c0_9 = arith.constant 0 : index
    %c0_10 = arith.constant 0 : index
    %30 = vector.load %arg7[%c0_9, %c0_10] : memref<8x128xf32, #tpu.memory_space<vmem>>, vector<8x128xf32>
    %31 = vector.shape_cast %29 : vector<8x128xf32> to vector<1x8x128xf32>
    %cst_11 = arith.constant dense<0.000000e+00> : vector<8x128xf32>
    %32 = vector.multi_reduction <add>, %31, %cst_11 [0] : vector<1x8x128xf32> to vector<8x128xf32>
    %33 = arith.addf %30, %32 : vector<8x128xf32>
    %c0_12 = arith.constant 0 : index
    %c0_13 = arith.constant 0 : index
    %34 = vector.load %arg7[%c0_12, %c0_13] : memref<8x128xf32, #tpu.memory_space<vmem>>, vector<8x128xf32>
    tpu.vector_store %arg7[%c0_12, %c0_13], %33 {strides = array<i32>} : memref<8x128xf32, #tpu.memory_space<vmem>>, vector<8x128xf32>,
    %c0_i32_14 = arith.constant 0 : i32
    %35 = arith.cmpi eq, %arg1, %c0_i32_14 : i32
    %36 = arith.extui %35 : i1 to i32
    %c0_i32_15 = arith.constant 0 : i32
    %37 = arith.cmpi ne, %36, %c0_i32_15 : i32
    scf.if %37 {
      %c0_i32_16 = arith.constant 0 : i32
      %38 = arith.cmpi eq, %arg0, %c0_i32_16 : i32
      %39 = arith.extui %38 : i1 to i32
      %40 = arith.sitofp %39 : i32 to f32
      %c0_17 = arith.constant 0 : index
      %c0_18 = arith.constant 0 : index
      %41 = vector.load %arg4[%c0_17, %c0_18] : memref<8x128xf32, #tpu.memory_space<vmem>>, vector<8x128xf32>
      %c0_19 = arith.constant 0 : index
      %c0_20 = arith.constant 0 : index
      %42 = vector.load %arg5[%c0_19, %c0_20] : memref<8x128xf32, #tpu.memory_space<vmem>>, vector<8x128xf32>
      %43 = math.log %41 : vector<8x128xf32>
      %cst_21 = arith.constant -1.000000e+02 : f32
      %44 = vector.broadcast %cst_21 : f32 to vector<8x128xf32>
      %45 = arith.maximumf %43, %44 : vector<8x128xf32>
      %cst_22 = arith.constant 1.000000e+00 : f32
      %46 = vector.broadcast %cst_22 : f32 to vector<8x128xf32>
      %47 = arith.subf %46, %41 : vector<8x128xf32>
      %48 = math.log %47 : vector<8x128xf32>
      %cst_23 = arith.constant -1.000000e+02 : f32
      %49 = vector.broadcast %cst_23 : f32 to vector<8x128xf32>
      %50 = arith.maximumf %48, %49 : vector<8x128xf32>
      %51 = arith.mulf %42, %45 : vector<8x128xf32>
      %cst_24 = arith.constant 1.000000e+00 : f32
      %52 = vector.broadcast %cst_24 : f32 to vector<8x128xf32>
      %53 = arith.subf %52, %42 : vector<8x128xf32>
      %54 = arith.mulf %53, %50 : vector<8x128xf32>
      %55 = arith.addf %51, %54 : vector<8x128xf32>
      %cst_25 = arith.constant 0.000000e+00 : f32
      %56 = vector.broadcast %cst_25 : f32 to vector<8x128xf32>
      %57 = arith.subf %56, %55 : vector<8x128xf32>
      %58 = vector.shape_cast %57 : vector<8x128xf32> to vector<1x8x128xf32>
      %cst_26 = arith.constant dense<0.000000e+00> : vector<8x128xf32>
      %59 = vector.multi_reduction <add>, %58, %cst_26 [0] : vector<1x8x128xf32> to vector<8x128xf32>
      %c0_27 = arith.constant 0 : index
      %c0_28 = arith.constant 0 : index
      %60 = vector.load %arg7[%c0_27, %c0_28] : memref<8x128xf32, #tpu.memory_space<vmem>>, vector<8x128xf32>
      %cst_29 = arith.constant 9.765625E-4 : f32
      %61 = vector.broadcast %cst_29 : f32 to vector<8x128xf32>
      %62 = arith.mulf %60, %61 : vector<8x128xf32>
      %cst_30 = arith.constant 2.500000e-01 : f32
      %63 = arith.mulf %40, %cst_30 : f32
      %64 = vector.broadcast %63 : f32 to vector<8x128xf32>
      %65 = arith.mulf %59, %64 : vector<8x128xf32>
      %66 = arith.addf %62, %65 : vector<8x128xf32>
      %67 = vector.shape_cast %66 : vector<8x128xf32> to vector<1x8x128xf32>
      %c0_31 = arith.constant 0 : index
      %c0_32 = arith.constant 0 : index
      %c0_33 = arith.constant 0 : index
      %68 = vector.load %arg6[%c0_31, %c0_32, %c0_33] : memref<1x8x128xf32, #tpu.memory_space<vmem>>, vector<1x8x128xf32>
      tpu.vector_store %arg6[%c0_31, %c0_32, %c0_33], %67 {strides = array<i32>} : memref<1x8x128xf32, #tpu.memory_space<vmem>>, vector<1x8x128xf32>,
    } else {
    }
    return
  }
  func.func @transform_0(%arg0: i32, %arg1: i32) -> (i32, i32) {
    %c1_i32 = arith.constant 1 : i32
    %0 = arith.muli %arg0, %c1_i32 : i32
    %1 = arith.addi %0, %arg1 : i32
    %c0_i32 = arith.constant 0 : i32
    %2 = arith.minsi %1, %c0_i32 : i32
    %c0_i32_0 = arith.constant 0 : i32
    %c0_i32_1 = arith.constant 0 : i32
    return %2, %c0_i32_0 : i32, i32
  }
  func.func @transform_1(%arg0: i32, %arg1: i32) -> (i32, i32) {
    %c1_i32 = arith.constant 1 : i32
    %0 = arith.muli %arg0, %c1_i32 : i32
    %1 = arith.addi %0, %arg1 : i32
    %c0_i32 = arith.constant 0 : i32
    %2 = arith.minsi %1, %c0_i32 : i32
    %c0_i32_0 = arith.constant 0 : i32
    %c0_i32_1 = arith.constant 0 : i32
    return %2, %c0_i32_0 : i32, i32
  }
  func.func @transform_2(%arg0: i32, %arg1: i32) -> (i32, i32) {
    %c0_i32 = arith.constant 0 : i32
    %c0_i32_0 = arith.constant 0 : i32
    %c0_i32_1 = arith.constant 0 : i32
    return %c0_i32, %c0_i32_0 : i32, i32
  }
  func.func @transform_3(%arg0: i32, %arg1: i32) -> (i32, i32) {
    %c0_i32 = arith.constant 0 : i32
    %c0_i32_0 = arith.constant 0 : i32
    %c0_i32_1 = arith.constant 0 : i32
    return %c0_i32, %c0_i32_0 : i32, i32
  }
  func.func @transform_4(%arg0: i32, %arg1: i32) -> (i32, i32, i32) {
    %c0_i32 = arith.constant 0 : i32
    %c0_i32_0 = arith.constant 0 : i32
    %c0_i32_1 = arith.constant 0 : i32
    return %arg0, %c0_i32, %c0_i32_0 : i32, i32, i32
  }
}

</mosaic_0001>

<bundles_post_ra>
// kernel: tpu_custom_call.1
= control target key start
LH: loop header
LB: loop body
LE: loop exit
PB: predicated region body
PF: predicated region fallthrough
CT: control target
= control target key end

     0   :  { %9 = vsyncpa [#allocation4], 0  ;;  %s383_s0 = inlined_call_operand.hbm [shape: f32[4,128], index: 0, kind: input, shape index: {}]   ;;  %s384_s1 = inlined_call_operand.hbm [shape: f32[4,128], index: 1, kind: input, shape index: {}]   ;;  %s385_s2 = inlined_call_operand.hbm [shape: f32[8,128], index: 2, kind: input, shape index: {}]   ;;  %s386_s3 = inlined_call_operand.hbm [shape: f32[8,128], index: 3, kind: input, shape index: {}]   ;;  %s387_s4 = inlined_call_operand.hbm [shape: f32[1,8,128], index: 4, kind: output, shape index: {}]  }
   0x1   :  { %10 = vsyncpa [#allocation7], 0 }
   0x2   :  { %11 = vsyncpa [#allocation10], 0 }
   0x3   :  { %12 = vsyncpa [#allocation5], 0 }
   0x4   :  { %23 = vsyncadd [#allocation4], 64  ;;  %s28_s17 = sshll.u32 %s383_s0, 4  ;;  %s336_s18 = smov [#allocation3]   ;;  %s29_s17 = int_to_ptr.hbm [resolvable:$true] %s28_s17 }
   0x5   :  { %s30_s19 = sshll.u32 %s336_s18, 4  ;;  %s337_s20 = smov 64   ;;  %s31_s19 = int_to_ptr.vmem [resolvable:$true] %s30_s19 }
   0x6   :  { %s338_s21 = smov 4  }
   0x7   :  { %36 = dma.hbm_to_vmem [thread:$0]  %s29_s17, 64, %s31_s19, [#allocation4], %s337_s20, %s337_s20, %s338_s21  }
   0x8   :  { %47 = vsyncadd [#allocation7], 64  ;;  %s52_s24 = sshll.u32 %s384_s1, 4  ;;  %s339_s25 = smov [#allocation6]   ;;  %s53_s24 = int_to_ptr.hbm [resolvable:$true] %s52_s24 }
   0x9   :  { %s54_s26 = sshll.u32 %s339_s25, 4  ;;  %s66_s0 = sshll.u32 %s385_s2, 4  ;;  %s55_s26 = int_to_ptr.vmem [resolvable:$true] %s54_s26  ;;  %s67_s0 = int_to_ptr.hbm [resolvable:$true] %s66_s0 }
   0xa   :  { %60 = dma.hbm_to_vmem [thread:$0]  %s53_s24, 64, %s55_s26, [#allocation7], %s337_s20, %s337_s20, %s338_s21  }
   0xb   :  { %s340_s29 = smov [#allocation8]   ;;  %s77_s7 = sshll.u32 %s386_s3, 4  ;;  %s78_s7 = int_to_ptr.hbm [resolvable:$true] %s77_s7 }
   0xc   :  { %s68_s30 = sshll.u32 %s340_s29, 4  ;;  %s341_s1 = smov [#allocation9]   ;;  %s69_s30 = int_to_ptr.vmem [resolvable:$true] %s68_s30 }
   0xd   :  { %71 = dma.hbm_to_vmem [thread:$0]  %s67_s0, 128, %s69_s30, [#allocation7]  }
   0xe   :  { %s79_s8 = sshll.u32 %s341_s1, 4  ;;  %s80_s8 = int_to_ptr.vmem [resolvable:$true] %s79_s8 }
   0xf   :  { %82 = dma.hbm_to_vmem [thread:$0]  %s78_s7, 128, %s80_s8, [#allocation10]  }
  0x10   :  { %328 = dma.done.wait [#allocation4], 128  }
  0x11   :  { %329 = vsyncadd [#allocation4], 4294967168 }
  0x12   :  { %330 = dma.done.wait [#allocation7], 256  }
  0x13   :  { %331 = vsyncadd [#allocation7], 4294967040 }
  0x14   :  { %332 = dma.done.wait [#allocation10], 128  }
  0x15   :  { %333 = vsyncadd [#allocation10], 4294967168  ;;  %v116_v0 = vld [vmem:[#allocation3] sm:$0xff]  ;;  %v148_v1 = vld [vmem:[#allocation8] sm:$0xff]  ;;  %v131_v10 = vlaneseq  ;;  %s342_s2 = smov [#allocation11]   ;;  %s177_s11 = sshll.u32 %s387_s4, 4  ;;  %s178_s11 = int_to_ptr.hbm [resolvable:$true] %s177_s11 }
  0x16   :  { %200 = vlog2.f32 %v116_v0  ;;  %v121_v2 = vsub.f32 1.0, %v116_v0  ;;  %v153_v3 = vsub.f32 1.0, %v148_v1  ;;  %v117_v5 = vld [vmem:[#allocation6] sm:$0xff]  ;;  %v149_v8 = vld [vmem:[#allocation9] sm:$0xff]  ;;  %s175_s3 = sshll.u32 %s342_s2, 4  ;;  %s176_s3 = int_to_ptr.vmem [resolvable:$true] %s175_s3 }
  0x17   :  { %202 = vlog2.f32 %v148_v1  ;;  %v126_v15 = vsub.f32 1.0, %v117_v5  ;;  %v158_v18 = vsub.f32 1.0, %v149_v8  ;;  %v132_v21 = vshrl.u32 %v131_v10, 7 }
  0x18   :  { %204 = vlog2.f32 %v121_v2 }
  0x19   :  { %206 = vlog2.f32 %v153_v3  ;;  %vm136_vm0 = vcmp.lt.s32.totalorder %v132_v21, 4 }
  0x1c   :  { %v201_v4 = vpop.eup %200 }
  0x1d   :  { %v203_v6 = vpop.eup %202  ;;  %v119_v7 = vmul.f32 0.6931472, %v201_v4 }
  0x1e   :  { %v205_v9 = vpop.eup %204  ;;  %v151_v11 = vmul.f32 0.6931472, %v203_v6 }
  0x1f   :  { %v207_v12 = vpop.eup %206  ;;  %v120_v13 = vmax.f32 %v119_v7, -100.0  ;;  %v123_v14 = vmul.f32 0.6931472, %v205_v9 }
  0x20   :  { %v152_v16 = vmax.f32 %v151_v11, -100.0  ;;  %v155_v17 = vmul.f32 0.6931472, %v207_v12 }
  0x21   :  { %v124_v19 = vmax.f32 %v123_v14, -100.0  ;;  %v125_v20 = vmul.f32 %v120_v13, %v117_v5 }
  0x22   :  { %v156_v22 = vmax.f32 %v155_v17, -100.0  ;;  %v157_v23 = vmul.f32 %v152_v16, %v149_v8 }
  0x23   :  { %v127_v24 = vmul.f32 %v126_v15, %v124_v19 }
  0x24   :  { %v159_v25 = vmul.f32 %v158_v18, %v156_v22 }
  0x25   :  { %v128_v26 = vadd.f32 %v127_v24, %v125_v20 }
  0x26   :  { %v160_v27 = vadd.f32 %v159_v25, %v157_v23 }
  0x27   :  { %v129_v28 = vsub.f32 0.0, %v128_v26 }
  0x28   :  { %v161_v29 = vsub.f32 0.0, %v160_v27 }
  0x29   :  { %v137_v30 = vsel %vm136_vm0, %v129_v28, 0.0 }
  0x2a   :  { %v164_v31 = vmul.f32 0.0009765625, %v137_v30  ;;  %v167_v32 = vmul.f32 0.25, %v161_v29 }
  0x2c   :  { %v168_v33 = vadd.f32 %v167_v32, %v164_v31 }
  0x2e   :  { %169 = vst [vmem:[#allocation11] sm:$0xff] %v168_v33 }
  0x2f   :  { %180 = dma.vmem_to_hbm [thread:$0]  %s176_s3, 128, %s178_s11, [#allocation5]  }
  0x30   :  { %334 = dma.done.wait [#allocation5], 128  }
  0x31   :  { %335 = vsyncadd [#allocation5], 4294967168 }
  0x32   :  { %185 = vsyncpa [#allocation4], 1 }
  0x33   :  { %186 = vsyncpa [#allocation7], 1 }
  0x34   :  { %187 = vsyncpa [#allocation10], 1 }
  0x35   :  { %188 = vsyncpa [#allocation5], 1 }

</bundles_post_ra>
